<compile_context>
chip_gen: v5e
topology: v5e:2x2
jax: 0.10.0
libtpu: 0.0.40
codegen_flags: <defaults>
</compile_context>

<pallas_src>
import functools

import jax
import jax.numpy as jnp
from jax import lax
from jax.experimental import pallas as pl
from jax.experimental.pallas import tpu as pltpu

BN_EPS = 1e-5
_ROW_ALIGN = 16  # bf16 packs 2 rows / 32-bit sublane word -> keep flat-row offsets 16-aligned


def _round_up(v, m):
    return (v + m - 1) // m * m


def _vmem_limit_bytes():
    # Per-generation scoped-VMEM cap (do not hard-code the v7x-safe 32 MiB on
    # 128-MiB v5e/v6e parts). Falls back to a conservative value.
    try:
        cap = int(pltpu.get_tpu_info().vmem_capacity_bytes)
    except Exception:
        cap = 64 * 1024 * 1024
    return int(min(max(cap - 16 * 1024 * 1024, 32 * 1024 * 1024),
                   100 * 1024 * 1024))


def _pick_th(H, Wp, Cout):
    # Largest divisor of H such that the f32 register accumulator
    # (th*Wp, Cout) stays <= ~128 KiB.  For typical Cout this puts th*Wp in
    # the 256-512 row range, amortizing MXU weight push / drain and the
    # per-grid-step overhead.
    best = 1
    for th in range(1, H + 1):
        if H % th == 0 and th * Wp * Cout * 4 <= 128 * 1024:
            best = th
    return best


# ----------------------------------------------------------------------------
# Kernel: one (n, h-block) tile of  dilated 3x3 conv + folded-BN shift + ReLU.
# ----------------------------------------------------------------------------
def _aspp_conv_kernel(x_ref, w_ref, shift_ref, o_ref, *, tap_offsets, th, W, Wp):
    # x_ref     : (1, Hp*Wp, 3*Cin) bf16 -- kx-packed flattened padded image,
    #                                       resident across the h grid axis.
    # w_ref     : (3, 3*Cin, Cout)  bf16 -- BN-scale-folded weights, one slab
    #                                       per ky tap (kx-major channels).
    # shift_ref : (1, Cout)         f32  -- folded BN shift (+ conv bias).
    # o_ref     : (1, th, W, Cout)  f32
    Cout = w_ref.shape[-1]
    M = th * Wp                                      # MXU rows per tile
    base = pl.multiple_of(pl.program_id(1) * M, M)   # flat row of this h block

    acc = None                                       # f32 accumulator in vregs
    for t, off in enumerate(tap_offsets):            # static unroll: 3 ky taps
        patch = x_ref[0, pl.ds(base + off, M), :]    # (M, 3*Cin) bf16, aligned
        part = jnp.dot(patch, w_ref[t], preferred_element_type=jnp.float32)
        acc = part if acc is None else acc + part

    y = jnp.maximum(acc + shift_ref[...], 0.0)       # BN shift + ReLU epilogue
    y = y.reshape(th, Wp, Cout)[:, :W, :]            # drop pad cols (Wp % 8 == 0)
    o_ref[...] = y.reshape(1, th, W, Cout).astype(o_ref.dtype)


# ----------------------------------------------------------------------------
# Wrapper (NCHW public interface, inference-mode BN folded into scale/shift)
# ----------------------------------------------------------------------------
@functools.partial(jax.jit, static_argnames=("rate",))
def aspp_conv_forward(x_nchw, w_hwio, conv_bias, gamma, beta, mean, var, *, rate):
    """_AsppConv forward: x (N,Cin,H,W) f32 -> (N,Cout,H,W) f32."""
    N, Cin, H, W = x_nchw.shape
    Cout = w_hwio.shape[-1]

    # --- fold BN (+ conv bias):  BN(conv(x) + b) = conv(x; w*scale) + shift --
    scale = gamma * lax.rsqrt(var + BN_EPS)
    shift = (beta + (conv_bias - mean) * scale).astype(jnp.float32).reshape(1, Cout)
    w_folded = (w_hwio * scale).astype(jnp.bfloat16)          # (3,3,Cin,Cout)

    # --- pad + flatten + kx-pack the input (fused XLA prologue) --------------
    Wp = _round_up(W + 2 * rate, _ROW_ALIGN)   # padded width, tile aligned
    Hp = H + 2 * rate
    x = jnp.transpose(x_nchw, (0, 2, 3, 1)).astype(jnp.bfloat16)   # NHWC bf16
    # one extra zero row at the bottom so every kx-shifted flat window is in bounds
    xp = jnp.pad(x, ((0, 0), (rate, rate + 1), (rate, Wp - W - rate), (0, 0)))
    xflat = xp.reshape(N, (Hp + 1) * Wp, Cin)
    L = Hp * Wp
    # kx-major channel packing: xk[n, f, kx*Cin:(kx+1)*Cin] == xflat[n, f + kx*rate]
    xk = jnp.concatenate(
        [xflat[:, kx * rate:kx * rate + L, :] for kx in range(3)], axis=-1)
    wk = w_folded.reshape(3, 3 * Cin, Cout)        # slab per ky, kx-major chans

    th = _pick_th(H, Wp, Cout)
    tap_offsets = tuple(ky * rate * Wp for ky in range(3))   # all 16-aligned

    out_nhwc = pl.pallas_call(
        functools.partial(_aspp_conv_kernel, tap_offsets=tap_offsets,
                          th=th, W=W, Wp=Wp),
        out_shape=jax.ShapeDtypeStruct((N, H, W, Cout), jnp.float32),
        grid=(N, H // th),
        in_specs=[
            # Full packed image per batch item: block index independent of h,
            # so it is streamed from HBM once per image and stays resident.
            pl.BlockSpec((1, L, 3 * Cin), lambda n, h: (n, 0, 0)),
            pl.BlockSpec((3, 3 * Cin, Cout), lambda n, h: (0, 0, 0)),
            pl.BlockSpec((1, Cout), lambda n, h: (0, 0)),
        ],
        out_specs=pl.BlockSpec((1, th, W, Cout), lambda n, h: (n, h, 0, 0)),
        compiler_params=pltpu.CompilerParams(
            dimension_semantics=("parallel", "parallel"),
            vmem_limit_bytes=_vmem_limit_bytes(),
        ),
    )(xk, wk, shift)

    return jnp.transpose(out_nhwc, (0, 3, 1, 2))   # -> NCHW (module interface)


# ----------------------------------------------------------------------------
if __name__ == "__main__":
    def run_config(key, N, Cin, Cout, H, W, rates, use_bias):
        ks = jax.random.split(key, 7)
        x = jax.random.normal(ks[0], (N, Cin, H, W), jnp.float32)
        w = 0.1 * jax.random.normal(ks[1], (3, 3, Cin, Cout), jnp.float32)  # HWIO
        b = (0.1 * jax.random.normal(ks[2], (Cout,), jnp.float32)
             if use_bias else jnp.zeros((Cout,), jnp.float32))
        gamma = 1.0 + 0.1 * jax.random.normal(ks[3], (Cout,), jnp.float32)
        beta = 0.1 * jax.random.normal(ks[4], (Cout,), jnp.float32)
        mean = 0.1 * jax.random.normal(ks[5], (Cout,), jnp.float32)
        var = 1.0 + 0.1 * jnp.abs(jax.random.normal(ks[6], (Cout,), jnp.float32))

        # Reference sees the same folding + bf16 rounding as the kernel.
        scale = gamma * lax.rsqrt(var + BN_EPS)
        shift = beta + (b - mean) * scale
        wf = (w * scale).astype(jnp.bfloat16).astype(jnp.float32)
        x32 = x.astype(jnp.bfloat16).astype(jnp.float32)

        for rate in rates:
            out = aspp_conv_forward(x, w, b, gamma, beta, mean, var, rate=rate)
            out = jax.block_until_ready(out)
            assert out.shape == (N, Cout, H, W), out.shape
            assert bool(jnp.all(jnp.isfinite(out)))

            ref = lax.conv_general_dilated(
                x32, wf, window_strides=(1, 1),
                padding=((rate, rate), (rate, rate)),
                rhs_dilation=(rate, rate),
                dimension_numbers=("NCHW", "HWIO", "NCHW"),
                precision=lax.Precision.HIGHEST,
                preferred_element_type=jnp.float32)
            ref = jnp.maximum(ref + shift.reshape(1, Cout, 1, 1), 0.0)
            err = float(jnp.max(jnp.abs(out - ref)))
            assert err < 2e-3, (Cin, Cout, rate, err)

    key = jax.random.PRNGKey(0)
    k1, k2 = jax.random.split(key)
    run_config(k1, N=2, Cin=16, Cout=32, H=16, W=16, rates=(1, 2, 3), use_bias=True)
    run_config(k2, N=2, Cin=48, Cout=64, H=16, W=16, rates=(2,), use_bias=False)
    print("KERNEL_OK")
</pallas_src>

<mosaic_0001>
module attributes {stable_mosaic.version = 11 : i64} {
  func.func @_aspp_conv_kernel(%arg0: i32, %arg1: i32, %arg2: memref<1x576x48xbf16, #tpu.memory_space<vmem>>, %arg3: memref<3x48x32xbf16, #tpu.memory_space<vmem>>, %arg4: memref<1x32xf32, #tpu.memory_space<vmem>>, %arg5: memref<1x16x16x32xf32, #tpu.memory_space<vmem>>) attributes {dimension_semantics = [#tpu.dimension_semantics<parallel>, #tpu.dimension_semantics<parallel>], iteration_bounds = array<i64: 2, 1>, scalar_prefetch = 0 : i64, scratch_operands = 0 : i64, tpu.core_type = #tpu.core_type<tc>, window_params = [{transform_indices = @transform_0, window_bounds = array<i64: 1, 576, 48>}, {pipeline_mode = #tpu.pipeline_mode<synchronous>, transform_indices = @transform_1, window_bounds = array<i64: 3, 48, 32>}, {pipeline_mode = #tpu.pipeline_mode<synchronous>, transform_indices = @transform_2, window_bounds = array<i64: 1, 32>}, {transform_indices = @transform_3, window_bounds = array<i64: 1, 16, 16, 32>}]} {
    %c512_i32 = arith.constant 512 : i32
    %0 = arith.muli %arg1, %c512_i32 : i32
    %1 = tpu.assume_multiple %0, 512 : i32
    %c0_i32 = arith.constant 0 : i32
    %2 = arith.addi %1, %c0_i32 : i32
    %c0 = arith.constant 0 : index
    %3 = arith.index_cast %2 : i32 to index
    %c0_0 = arith.constant 0 : index
    %4 = vector.load %arg2[%c0, %3, %c0_0] : memref<1x576x48xbf16, #tpu.memory_space<vmem>>, vector<1x512x48xbf16>
    %5 = vector.shape_cast %4 : vector<1x512x48xbf16> to vector<512x48xbf16>
    %c0_1 = arith.constant 0 : index
    %c0_2 = arith.constant 0 : index
    %c0_3 = arith.constant 0 : index
    %6 = vector.load %arg3[%c0_1, %c0_2, %c0_3] : memref<3x48x32xbf16, #tpu.memory_space<vmem>>, vector<1x48x32xbf16>
    %7 = vector.shape_cast %6 : vector<1x48x32xbf16> to vector<48x32xbf16>
    %cst = arith.constant dense<0.000000e+00> : vector<512x32xf32>
    %8 = tpu.matmul %5, %7, %cst {dimension_numbers = #tpu.dot_dimension_numbers<[1], [0], [0], [1], [0, 0, 1, 1], [], []>} : vector<512x48xbf16>, vector<48x32xbf16>, vector<512x32xf32> -> vector<512x32xf32>
    %c32_i32 = arith.constant 32 : i32
    %9 = arith.addi %1, %c32_i32 : i32
    %c0_4 = arith.constant 0 : index
    %10 = arith.index_cast %9 : i32 to index
    %c0_5 = arith.constant 0 : index
    %11 = vector.load %arg2[%c0_4, %10, %c0_5] : memref<1x576x48xbf16, #tpu.memory_space<vmem>>, vector<1x512x48xbf16>
    %12 = vector.shape_cast %11 : vector<1x512x48xbf16> to vector<512x48xbf16>
    %c1 = arith.constant 1 : index
    %c0_6 = arith.constant 0 : index
    %c0_7 = arith.constant 0 : index
    %13 = vector.load %arg3[%c1, %c0_6, %c0_7] : memref<3x48x32xbf16, #tpu.memory_space<vmem>>, vector<1x48x32xbf16>
    %14 = vector.shape_cast %13 : vector<1x48x32xbf16> to vector<48x32xbf16>
    %cst_8 = arith.constant dense<0.000000e+00> : vector<512x32xf32>
    %15 = tpu.matmul %12, %14, %cst_8 {dimension_numbers = #tpu.dot_dimension_numbers<[1], [0], [0], [1], [0, 0, 1, 1], [], []>} : vector<512x48xbf16>, vector<48x32xbf16>, vector<512x32xf32> -> vector<512x32xf32>
    %16 = arith.addf %8, %15 : vector<512x32xf32>
    %c64_i32 = arith.constant 64 : i32
    %17 = arith.addi %1, %c64_i32 : i32
    %c0_9 = arith.constant 0 : index
    %18 = arith.index_cast %17 : i32 to index
    %c0_10 = arith.constant 0 : index
    %19 = vector.load %arg2[%c0_9, %18, %c0_10] : memref<1x576x48xbf16, #tpu.memory_space<vmem>>, vector<1x512x48xbf16>
    %20 = vector.shape_cast %19 : vector<1x512x48xbf16> to vector<512x48xbf16>
    %c2 = arith.constant 2 : index
    %c0_11 = arith.constant 0 : index
    %c0_12 = arith.constant 0 : index
    %21 = vector.load %arg3[%c2, %c0_11, %c0_12] : memref<3x48x32xbf16, #tpu.memory_space<vmem>>, vector<1x48x32xbf16>
    %22 = vector.shape_cast %21 : vector<1x48x32xbf16> to vector<48x32xbf16>
    %cst_13 = arith.constant dense<0.000000e+00> : vector<512x32xf32>
    %23 = tpu.matmul %20, %22, %cst_13 {dimension_numbers = #tpu.dot_dimension_numbers<[1], [0], [0], [1], [0, 0, 1, 1], [], []>} : vector<512x48xbf16>, vector<48x32xbf16>, vector<512x32xf32> -> vector<512x32xf32>
    %24 = arith.addf %16, %23 : vector<512x32xf32>
    %c0_14 = arith.constant 0 : index
    %c0_15 = arith.constant 0 : index
    %25 = vector.load %arg4[%c0_14, %c0_15] : memref<1x32xf32, #tpu.memory_space<vmem>>, vector<1x32xf32>
    %26 = vector.broadcast %25 : vector<1x32xf32> to vector<512x32xf32>
    %27 = arith.addf %24, %26 : vector<512x32xf32>
    %cst_16 = arith.constant 0.000000e+00 : f32
    %28 = vector.broadcast %cst_16 : f32 to vector<512x32xf32>
    %29 = arith.maximumf %27, %28 : vector<512x32xf32>
    %30 = vector.shape_cast %29 : vector<512x32xf32> to vector<16x32x32xf32>
    %31 = vector.extract_strided_slice %30 {offsets = [0, 0, 0], sizes = [16, 16, 32], strides = [1, 1, 1]} : vector<16x32x32xf32> to vector<16x16x32xf32>
    %32 = vector.shape_cast %31 : vector<16x16x32xf32> to vector<1x16x16x32xf32>
    %c0_17 = arith.constant 0 : index
    %c0_18 = arith.constant 0 : index
    %c0_19 = arith.constant 0 : index
    %c0_20 = arith.constant 0 : index
    %33 = vector.load %arg5[%c0_17, %c0_18, %c0_19, %c0_20] : memref<1x16x16x32xf32, #tpu.memory_space<vmem>>, vector<1x16x16x32xf32>
    tpu.vector_store %arg5[%c0_17, %c0_18, %c0_19, %c0_20], %32 {strides = array<i32>} : memref<1x16x16x32xf32, #tpu.memory_space<vmem>>, vector<1x16x16x32xf32>,
    return
  }
  func.func @transform_0(%arg0: i32, %arg1: i32) -> (i32, i32, i32) {
    %c0_i32 = arith.constant 0 : i32
    %c0_i32_0 = arith.constant 0 : i32
    %c0_i32_1 = arith.constant 0 : i32
    return %arg0, %c0_i32, %c0_i32_0 : i32, i32, i32
  }
  func.func @transform_1(%arg0: i32, %arg1: i32) -> (i32, i32, i32) {
    %c0_i32 = arith.constant 0 : i32
    %c0_i32_0 = arith.constant 0 : i32
    %c0_i32_1 = arith.constant 0 : i32
    %c0_i32_2 = arith.constant 0 : i32
    return %c0_i32, %c0_i32_0, %c0_i32_1 : i32, i32, i32
  }
  func.func @transform_2(%arg0: i32, %arg1: i32) -> (i32, i32) {
    %c0_i32 = arith.constant 0 : i32
    %c0_i32_0 = arith.constant 0 : i32
    %c0_i32_1 = arith.constant 0 : i32
    return %c0_i32, %c0_i32_0 : i32, i32
  }
  func.func @transform_3(%arg0: i32, %arg1: i32) -> (i32, i32, i32, i32) {
    %c0_i32 = arith.constant 0 : i32
    %c0_i32_0 = arith.constant 0 : i32
    %c0_i32_1 = arith.constant 0 : i32
    return %arg0, %arg1, %c0_i32, %c0_i32_0 : i32, i32, i32, i32
  }
}

</mosaic_0001>

<bundles_post_ra>
// kernel: aspp_conv_forward.1
= control target key start
LH: loop header
LB: loop body
LE: loop exit
PB: predicated region body
PF: predicated region fallthrough
CT: control target
= control target key end

     0   :  { %8 = vsyncpa [#allocation3], 0  ;;  %s3295_s0 = inlined_call_operand.vmem [shape: bf16[2,576,48], index: 0, kind: input, shape index: {}]   ;;  %s3296_s1 = inlined_call_operand.vmem [shape: bf16[3,48,32], index: 1, kind: input, shape index: {}]   ;;  %s3297_s2 = inlined_call_operand.vmem [shape: f32[1,32], index: 2, kind: input, shape index: {}]   ;;  %s3298_s3 = inlined_call_operand.hbm [shape: f32[2,16,16,32], index: 3, kind: output, shape index: {}]  }
   0x1   :  { %10 = vsyncpa [#allocation3 + $0x1], 0  ;;  %s2821_s12 = smov 0   ;;  %s2823_s13 = smov 0  }
   0x2   :  { %s2825_s14 = smov 0   ;;  %s2827_s15 = smov 0  }
   0x3   :  { %s2829_s16 = smov 0   ;;  %s2831_s17 = smov 0  }
   0x4 LB: > { %s1877_s18 = sadd.s32 4294967295, %s2797_s17   ;;  %s1878_s19 = sadd.s32 4294967294, %s2797_s17   ;;  %s2797_s17 = sphi %s2831_s17, %s16_s17   ;;  %s2793_s16 = sphi %s2829_s16, %s3305_s16   ;;  %s2789_s15 = sphi %s2827_s15, %s3304_s15   ;;  %s2785_s14 = sphi %s2825_s14, %s3303_s14   ;;  %s2781_s13 = sphi %s2823_s13, %s3302_s13   ;;  %s2777_s12 = sphi %s2821_s12, %s3301_s12  }
   0x5   : > { %s28_s20 = sadd.s32 1, %s2793_s16  ;;  %s105_s21 = sadd.s32 1, %s2785_s14 }
   0x6   : > { %p30_p0 = scmp.ge.s32.totalorder %s28_s20, 2  ;;  %p115_p1 = scmp.ne.s32.totalorder %s2785_s14, %s2781_s13 }
   0x7   : > { %p116_p2 = scmp.eq.s32.totalorder %s1877_s18, 1  ;;  %p121_p3 = scmp.ne.s32.totalorder %s2781_s13, %s2777_s12 }
   0x8   : > { %s3307_s20 = smov (%p30_p0, %s28_s20), 0  ;;  %p122_p5 = scmp.eq.s32.totalorder %s1878_s19, 1 }
   0x9   : > { %p2861_p4 = por %p116_p2, %p115_p1  ;;  %s100_s23 = ssub.s32 %s2793_s16, %s3307_s20 }
   0xa   : > { %p1881_p6 = scmp.ge.s32.totalorder %s2797_s17, 1  ;;  %p103_p7 = scmp.eq.s32.totalorder %s100_s23, 0 }
   0xb   : > { %p2868_p8 = por %p122_p5, %p121_p3  ;;  %p154_p9 = scmp.lt.s32.totalorder %s2797_s17, 3 }
   0xc   : > { %s2874_s25 = scalar_select %p103_p7, %s2785_s14, %s105_s21  }
   0xd   : > { %p155_p10 = pnand %p1881_p6, %p154_p9 }
   0xe   : > { %p178_p11 = scmp.lt.s32.totalorder (!%p155_p10), %s2789_s15, 1  ;;  %s175_s5 = sand.u32 (!%p155_p10), 1, %s2781_s13  }
   0xf   : > { %158 = sbr.rel (%p155_p10) target bundleno = 542 (0x21e), region = 32  ;;  %s1882_s8 = sshll.u32 (!%p155_p10), %s175_s5, 8 }
  0x10   : > { %s2993_s9 = scalar_lea.vmem (!%p155_p10), [#allocation2], %s1882_s8  ;;  %s2650_s10 = sshll.u32 (!%p155_p10), %s2789_s15, 8 }
  0x11   : > { %s1794_s19 = scalar_lea.hbm (!%p155_p10), %s3298_s3, %s2650_s10  ;;  %s1780_s23 = scalar_lea.sflag (!%p155_p10), [#allocation3], %s175_s5 }
  0x12   : > { %s1797_s21 = sshll.u32 (!%p155_p10), %s1794_s19, 4  ;;  %s2739_s30 = scalar_lea.hbm (!%p155_p10), %s3298_s3, 512  ;;  %s1798_s21 = int_to_ptr.hbm [resolvable:$true] %s1797_s21 }
  0x13   : > { %s2733_s26 = sshra.s32 (!%p155_p10), %s1798_s21, 4  ;;  %s2734_s26 = int_to_ptr.hbm [resolvable:$true] %s2733_s26 }
  0x14   : > { %v2614_v0 = vld [vmem:[%s3296_s1 + $0x28] sm:$0xff]  ;;  %v2579_v1 = vld [vmem:[%s3296_s1 + $0x10] sm:$0xff]  ;;  %v2649_v2 = vld [vmem:[%s3296_s1 + $0x40] sm:$0xff]  ;;  %s179_s7 = scalar_select %p178_p11, %s2789_s15, 1  ;;  %vm514_vm0 = vcmask 392192   ;;  %vm1746_vm1 = vcmask 261120  }
  0x15   : > { %616 = vmatpush.bf16.msra.mxu0 %v2614_v0  ;;  %2651 = vmatpush.bf16.msra.mxu3 %v2614_v0  ;;  %v2613_v3 = vld [vmem:[%s3296_s1 + $0x20] sm:$0xff]  ;;  %v2578_v4 = vld [vmem:[%s3296_s1 + $0x8] sm:$0xff]  ;;  %v2648_v5 = vld [vmem:[%s3296_s1 + $0x38] sm:$0xff]  ;;  %s1795_s15 = sshll.u32 %s2993_s9, 4  ;;  %p2740_p1 = scmp.lt.s32.totalorder %s2734_s26, %s3298_s3  ;;  %s1796_s15 = int_to_ptr.vmem [resolvable:$true] %s1795_s15 }
  0x16   : > { %1027 = vmatpush.bf16.msra.mxu1 %v2579_v1  ;;  %1514 = vmatpush.bf16.msra.mxu2 %v2649_v2  ;;  %s2660_s18 = smul.u32 288, %s179_s7  ;;  %v2612_v6 = vld [vmem:[%s3296_s1 + $0x18] sm:$0xff]  ;;  %v2577_v7 = vld [vmem:[%s3296_s1] sm:$0xff]  ;;  %v2647_v8 = vld [vmem:[%s3296_s1 + $0x30] sm:$0xff] }
  0x17   : > { %v2988_v49 = vld [vmem:[%s3297_s2] ss:$0 sm:$0xff] }
  0x18   : > { %s2902_s27 = scalar_lea.vmem %s3295_s0, %s2660_s18 }
  0x19   : > { %617 = vmatpush.bf16.msra.mxu0 %v2613_v3  ;;  %2652 = vmatpush.bf16.msra.mxu3 %v2613_v3  ;;  %v2580_v9 = vld [vmem:[%s2902_s27 + $0x10] sm:$0xff]  ;;  %v2545_v11 = vld [vmem:[%s2902_s27] sm:$0xff]  ;;  %v2581_v13 = vld [vmem:[%s2902_s27 + $0x18] sm:$0xff] }
  0x1a   : > { %1028 = vmatpush.bf16.msra.mxu1 %v2578_v4  ;;  %1515 = vmatpush.bf16.msra.mxu2 %v2648_v5  ;;  %v2604_v10 = vld [vmem:[%s2902_s27 + $0xd0] sm:$0xff]  ;;  %v2615_v12 = vld [vmem:[%s2902_s27 + $0x20] sm:$0xff]  ;;  %v2605_v14 = vld [vmem:[%s2902_s27 + $0xd8] sm:$0xff] }
  0x1b   : > { %v2546_v15 = vld [vmem:[%s2902_s27 + $0x8] sm:$0xff]  ;;  %v2582_v17 = vld [vmem:[%s2902_s27 + $0x20] sm:$0xff]  ;;  %v2547_v19 = vld [vmem:[%s2902_s27 + $0x10] sm:$0xff] }
  0x1c   : > { %v2616_v16 = vld [vmem:[%s2902_s27 + $0x28] sm:$0xff]  ;;  %v2606_v18 = vld [vmem:[%s2902_s27 + $0xe0] sm:$0xff]  ;;  %v2617_v20 = vld [vmem:[%s2902_s27 + $0x30] sm:$0xff] }
  0x1d   : > { %618 = vmatpush.bf16.msra.mxu0 %v2612_v6  ;;  %2653 = vmatpush.bf16.msra.mxu3 %v2612_v6  ;;  %v2583_v21 = vld [vmem:[%s2902_s27 + $0x28] sm:$0xff]  ;;  %v2548_v23 = vld [vmem:[%s2902_s27 + $0x18] sm:$0xff]  ;;  %v2584_v25 = vld [vmem:[%s2902_s27 + $0x30] sm:$0xff] }
  0x1e   : > { %1029 = vmatpush.bf16.msra.mxu1 %v2577_v7  ;;  %1516 = vmatpush.bf16.msra.mxu2 %v2647_v8  ;;  %v2607_v22 = vld [vmem:[%s2902_s27 + $0xe8] sm:$0xff]  ;;  %v2618_v24 = vld [vmem:[%s2902_s27 + $0x38] sm:$0xff]  ;;  %v2608_v26 = vld [vmem:[%s2902_s27 + $0xf0] sm:$0xff] }
  0x1f   : > { %v2549_v27 = vld [vmem:[%s2902_s27 + $0x20] sm:$0xff]  ;;  %v2585_v29 = vld [vmem:[%s2902_s27 + $0x38] sm:$0xff]  ;;  %v2550_v31 = vld [vmem:[%s2902_s27 + $0x28] sm:$0xff] }
  0x20   : > { %2094 = vmatmul.msk.bf16.vlgmr.msra.gmra.mxu0 %vm514_vm0, %v2580_v9  ;;  %2118 = vmatmul.msk.bf16.vlgmr.msra.gmra.mxu3 %vm514_vm0, %v2604_v10  ;;  %v2619_v28 = vld [vmem:[%s2902_s27 + $0x40] sm:$0xff]  ;;  %v2609_v30 = vld [vmem:[%s2902_s27 + $0xf8] sm:$0xff]  ;;  %v2620_v32 = vld [vmem:[%s2902_s27 + $0x48] sm:$0xff] }
  0x21   : > { %2654 = vmatpush.bf16.msrb.mxu3 %v2579_v1  ;;  %2266 = vmatmul.msk.bf16.vlgmr.msra.gmra.mxu1 %vm514_vm0, %v2545_v11  ;;  %v2586_v33 = vld [vmem:[%s2902_s27 + $0x40] sm:$0xff]  ;;  %v2551_v35 = vld [vmem:[%s2902_s27 + $0x30] sm:$0xff]  ;;  %v2587_v37 = vld [vmem:[%s2902_s27 + $0x48] sm:$0xff] }
  0x22   : > { %2508 = vmatmul.msk.bf16.vlgmr.msra.gmra.mxu2 %vm514_vm0, %v2615_v12  ;;  %v2610_v34 = vld [vmem:[%s2902_s27 + $0x100] sm:$0xff]  ;;  %v2621_v36 = vld [vmem:[%s2902_s27 + $0x50] sm:$0xff]  ;;  %v2611_v38 = vld [vmem:[%s2902_s27 + $0x108] sm:$0xff] }
  0x23   : > { %v2552_v39 = vld [vmem:[%s2902_s27 + $0x38] sm:$0xff]  ;;  %v2588_v41 = vld [vmem:[%s2902_s27 + $0x50] sm:$0xff]  ;;  %v2569_v42 = vld [vmem:[%s2902_s27 + $0xc0] sm:$0xff] }
  0x24   : > { %v2622_v40 = vld [vmem:[%s2902_s27 + $0x58] sm:$0xff]  ;;  %v2553_v44 = vld [vmem:[%s2902_s27 + $0x40] sm:$0xff]  ;;  %v2570_v60 = vld [vmem:[%s2902_s27 + $0xc8] sm:$0xff] }
  0x25   : > { %2655 = vmatpush.bf16.msrb.mxu3 %v2578_v4  ;;  %v2623_v45 = vld [vmem:[%s2902_s27 + $0x60] sm:$0xff]  ;;  %v2589_v59 = vld [vmem:[%s2902_s27 + $0x58] sm:$0xff]  ;;  %v2554_v63 = vld [vmem:[%s2902_s27 + $0x48] sm:$0xff] }
  0x26   : > { %v2624_v0 = vld [vmem:[%s2902_s27 + $0x68] sm:$0xff]  ;;  %v2590_v10 = vld [vmem:[%s2902_s27 + $0x60] sm:$0xff]  ;;  %v2571_v11 = vld [vmem:[%s2902_s27 + $0xd0] sm:$0xff] }
  0x29   : > { %2656 = vmatpush.bf16.msrb.mxu3 %v2577_v7 }
  0x2d   : > { %2657 = vmatpush.bf16.msra.mxu3 %v2649_v2 }
  0x30   : > { %2095 = vmatmul.msk.bf16.gmra.mxu0 %vm514_vm0, %v2581_v13  ;;  %2119 = vmatmul.msk.bf16.gmra.mxu3 %vm514_vm0, %v2605_v14  ;;  %v2555_v13 = vld [vmem:[%s2902_s27 + $0x50] sm:$0xff] }
  0x31   : > { %2658 = vmatpush.bf16.msra.mxu3 %v2648_v5  ;;  %2267 = vmatmul.msk.bf16.gmra.mxu1 %vm514_vm0, %v2546_v15  ;;  %v2625_v14 = vld [vmem:[%s2902_s27 + $0x70] sm:$0xff] }
  0x32   : > { %2509 = vmatmul.msk.bf16.gmra.mxu2 %vm514_vm0, %v2616_v16 }
  0x35   : > { %2659 = vmatpush.bf16.msra.mxu3 %v2647_v8 }
  0x40   : > { %2096 = vmatmul.msk.bf16.gmra.mxu0 %vm514_vm0, %v2582_v17  ;;  %2120 = vmatmul.msk.bf16.gmra.mxu3 %vm514_vm0, %v2606_v18 }
  0x41   : > { %2268 = vmatmul.msk.bf16.gmra.mxu1 %vm514_vm0, %v2547_v19 }
  0x42   : > { %2510 = vmatmul.msk.bf16.gmra.mxu2 %vm514_vm0, %v2617_v20 }
  0x50   : > { %2097 = vmatmul.msk.bf16.gmra.mxu0 %vm514_vm0, %v2583_v21  ;;  %2121 = vmatmul.msk.bf16.gmra.mxu3 %vm514_vm0, %v2607_v22 }
  0x51   : > { %2269 = vmatmul.msk.bf16.gmra.mxu1 %vm514_vm0, %v2548_v23 }
  0x52   : > { %2511 = vmatmul.msk.bf16.gmra.mxu2 %vm514_vm0, %v2618_v24 }
  0x60   : > { %2098 = vmatmul.msk.bf16.gmra.mxu0 %vm514_vm0, %v2584_v25  ;;  %2122 = vmatmul.msk.bf16.gmra.mxu3 %vm514_vm0, %v2608_v26 }
  0x61   : > { %2270 = vmatmul.msk.bf16.gmra.mxu1 %vm514_vm0, %v2549_v27  ;;  %v2591_v27 = vld [vmem:[%s2902_s27 + $0x68] sm:$0xff] }
  0x62   : > { %2512 = vmatmul.msk.bf16.gmra.mxu2 %vm514_vm0, %v2619_v28  ;;  %v2572_v28 = vld [vmem:[%s2902_s27 + $0xd8] sm:$0xff] }
  0x70   : > { %2099 = vmatmul.msk.bf16.gmra.mxu0 %vm514_vm0, %v2585_v29  ;;  %2123 = vmatmul.msk.bf16.gmra.mxu3 %vm514_vm0, %v2609_v30 }
  0x71   : > { %2271 = vmatmul.msk.bf16.gmra.mxu1 %vm514_vm0, %v2550_v31  ;;  %v2556_v31 = vld [vmem:[%s2902_s27 + $0x58] sm:$0xff] }
  0x72   : > { %2513 = vmatmul.msk.bf16.gmra.mxu2 %vm514_vm0, %v2620_v32  ;;  %v2626_v32 = vld [vmem:[%s2902_s27 + $0x78] sm:$0xff] }
  0x80   : > { %2100 = vmatmul.msk.bf16.gmra.mxu0 %vm514_vm0, %v2586_v33  ;;  %2124 = vmatmul.msk.bf16.gmra.mxu3 %vm514_vm0, %v2610_v34 }
  0x81   : > { %2272 = vmatmul.msk.bf16.gmra.mxu1 %vm514_vm0, %v2551_v35 }
  0x82   : > { %2514 = vmatmul.msk.bf16.gmra.mxu2 %vm514_vm0, %v2621_v36 }
  0x90   : > { %2101 = vmatmul.msk.bf16.gmra.mxu0 %vm514_vm0, %v2587_v37  ;;  %2125 = vmatmul.msk.bf16.gmra.mxu3 %vm514_vm0, %v2611_v38 }
  0x91   : > { %2273 = vmatmul.msk.bf16.gmra.mxu1 %vm514_vm0, %v2552_v39 }
  0x92   : > { %2515 = vmatmul.msk.bf16.gmra.mxu2 %vm514_vm0, %v2622_v40 }
  0x9d   : > { %v620_v43 = vpop.f32.mrf.mxu0 }
  0x9e   : > { %v1031_v46 = vpop.f32.mrf.mxu1 }
  0x9f   : > { %v1032_v47 = vadd.f32 %v1031_v46, %v620_v43  ;;  %v2573_v43 = vld [vmem:[%s2902_s27 + $0xe0] sm:$0xff] }
  0xa0   : > { %2102 = vmatmul.msk.bf16.gmra.mxu0 %vm514_vm0, %v2588_v41  ;;  %2290 = vmatmul.msk.bf16.vlgmr.msrb.gmra.mxu3 %vm514_vm0, %v2569_v42  ;;  %v2592_v42 = vld [vmem:[%s2902_s27 + $0x70] sm:$0xff]  ;;  %v2627_v46 = vld [vmem:[%s2902_s27 + $0x80] sm:$0xff] }
  0xa1   : > { %2274 = vmatmul.msk.bf16.gmra.mxu1 %vm514_vm0, %v2553_v44 }
  0xa2   : > { %2516 = vmatmul.msk.bf16.gmra.mxu2 %vm514_vm0, %v2623_v45  ;;  %v2557_v45 = vld [vmem:[%s2902_s27 + $0x60] sm:$0xff] }
  0xa3   : > { %v2983_v48 = vpop.f32.mrf.mxu3 }
  0xa5   : > { %v1518_v50 = vpop.f32.mrf.mxu2  ;;  %v622_v52 = vpop.f32.mrf.mxu0 }
  0xa6   : > { %v1646_v51 = vadd.f32 %v1518_v50, %v1032_v47  ;;  %v1033_v53 = vpop.f32.mrf.mxu1 }
  0xa7   : > { %v1034_v56 = vadd.f32 %v1033_v53, %v622_v52 }
  0xa8   : > { %v1682_v54 = vadd.f32 %v2988_v49, %v1646_v51 }
  0xaa   : > { %v1714_v55 = vmax.f32 %v1682_v54, 0.0 }
  0xab   : > { %v2997_v57 = vpop.f32.mrf.mxu3 }
  0xac   : > { %1747 = vst.msk [vmem:[%s2993_s9] sm:$0xff] %vm1746_vm1, %v1714_v55 }
  0xad   : > { %v1520_v58 = vpop.f32.mrf.mxu2  ;;  %v625_v62 = vpop.f32.mrf.mxu0 }
  0xae   : > { %v1647_v61 = vadd.f32 %v1520_v58, %v1034_v56  ;;  %v1036_v1 = vpop.f32.mrf.mxu1  ;;  %v2593_v62 = vld [vmem:[%s2902_s27 + $0x78] sm:$0xff] }
  0xb0   : > { %v1683_v2 = vadd.f32 %v2988_v49, %v1647_v61  ;;  %2103 = vmatmul.msk.bf16.gmra.mxu0 %vm514_vm0, %v2589_v59  ;;  %2291 = vmatmul.msk.bf16.gmra.mxu3 %vm514_vm0, %v2570_v60 }
  0xb1   : > { %2275 = vmatmul.msk.bf16.gmra.mxu1 %vm514_vm0, %v2554_v63  ;;  %v2574_v63 = vld [vmem:[%s2902_s27 + $0xe8] sm:$0xff] }
  0xb2   : > { %v1715_v3 = vmax.f32 %v1683_v2, 0.0  ;;  %2517 = vmatmul.msk.bf16.gmra.mxu2 %vm514_vm0, %v2624_v0  ;;  %v2558_v2 = vld [vmem:[%s2902_s27 + $0x68] sm:$0xff] }
  0xb3   : > { %v721_v4 = vpop.f32.mrf.mxu3 }
  0xb4   : > { %1748 = vst.msk [vmem:[%s2993_s9 + $0x8] sm:$0xff] %vm1746_vm1, %v1715_v3  ;;  %v2628_v3 = vld [vmem:[%s2902_s27 + $0x88] sm:$0xff] }
  0xb5   : > { %v1523_v5 = vpop.f32.mrf.mxu2  ;;  %v626_v6 = vpop.f32.mrf.mxu0 }
  0xb6   : > { %v1037_v7 = vpop.f32.mrf.mxu1 }
  0xbb   : > { %v722_v8 = vpop.f32.mrf.mxu3 }
  0xbd   : > { %v1524_v9 = vpop.f32.mrf.mxu2  ;;  %v628_v12 = vpop.f32.mrf.mxu0 }
  0xbe   : > { %v1039_v15 = vpop.f32.mrf.mxu1 }
  0xbf   : > { %v1040_v16 = vadd.f32 %v1039_v15, %v628_v12 }
  0xc0   : > { %2104 = vmatmul.msk.bf16.gmra.mxu0 %vm514_vm0, %v2590_v10  ;;  %2292 = vmatmul.msk.bf16.gmra.mxu3 %vm514_vm0, %v2571_v11 }
  0xc1   : > { %2276 = vmatmul.msk.bf16.gmra.mxu1 %vm514_vm0, %v2555_v13  ;;  %v2594_v13 = vld [vmem:[%s2902_s27 + $0x80] sm:$0xff] }
  0xc2   : > { %2518 = vmatmul.msk.bf16.gmra.mxu2 %vm514_vm0, %v2625_v14  ;;  %v2575_v14 = vld [vmem:[%s2902_s27 + $0xf0] sm:$0xff] }
  0xc3   : > { %v3018_v17 = vpop.f32.mrf.mxu3 }
  0xc5   : > { %v1526_v18 = vpop.f32.mrf.mxu2  ;;  %v630_v20 = vpop.f32.mrf.mxu0 }
  0xc6   : > { %v1648_v19 = vadd.f32 %v1526_v18, %v1040_v16  ;;  %v1041_v21 = vpop.f32.mrf.mxu1  ;;  %v2559_v16 = vld [vmem:[%s2902_s27 + $0x70] sm:$0xff] }
  0xc7   : > { %v1042_v24 = vadd.f32 %v1041_v21, %v630_v20  ;;  %v2629_v18 = vld [vmem:[%s2902_s27 + $0x90] sm:$0xff] }
  0xc8   : > { %v1684_v22 = vadd.f32 %v2988_v49, %v1648_v19 }
  0xca   : > { %v1716_v23 = vmax.f32 %v1684_v22, 0.0 }
  0xcb   : > { %v3023_v25 = vpop.f32.mrf.mxu3 }
  0xcc   : > { %1749 = vst.msk [vmem:[%s2993_s9 + $0x10] sm:$0xff] %vm1746_vm1, %v1716_v23 }
  0xcd   : > { %v1528_v26 = vpop.f32.mrf.mxu2  ;;  %v633_v30 = vpop.f32.mrf.mxu0 }
  0xce   : > { %v1649_v29 = vadd.f32 %v1528_v26, %v1042_v24  ;;  %v1044_v33 = vpop.f32.mrf.mxu1 }
  0xcf   : > { %v2576_v33 = vld [vmem:[%s2902_s27 + $0xf8] sm:$0xff] }
  0xd0   : > { %v1685_v34 = vadd.f32 %v2988_v49, %v1649_v29  ;;  %2105 = vmatmul.msk.bf16.gmra.mxu0 %vm514_vm0, %v2591_v27  ;;  %2293 = vmatmul.msk.bf16.gmra.mxu3 %vm514_vm0, %v2572_v28 }
  0xd1   : > { %2277 = vmatmul.msk.bf16.gmra.mxu1 %vm514_vm0, %v2556_v31 }
  0xd2   : > { %v1717_v35 = vmax.f32 %v1685_v34, 0.0  ;;  %2519 = vmatmul.msk.bf16.gmra.mxu2 %vm514_vm0, %v2626_v32  ;;  %v2595_v32 = vld [vmem:[%s2902_s27 + $0x88] sm:$0xff] }
  0xd3   : > { %v729_v36 = vpop.f32.mrf.mxu3 }
  0xd4   : > { %1750 = vst.msk [vmem:[%s2993_s9 + $0x18] sm:$0xff] %vm1746_vm1, %v1717_v35  ;;  %v2560_v36 = vld [vmem:[%s2902_s27 + $0x78] sm:$0xff] }
  0xd5   : > { %v1531_v37 = vpop.f32.mrf.mxu2  ;;  %v634_v38 = vpop.f32.mrf.mxu0 }
  0xd6   : > { %v1045_v39 = vpop.f32.mrf.mxu1  ;;  %v2630_v37 = vld [vmem:[%s2902_s27 + $0x98] sm:$0xff] }
  0xdb   : > { %v730_v40 = vpop.f32.mrf.mxu3 }
  0xdd   : > { %v1532_v41 = vpop.f32.mrf.mxu2  ;;  %v636_v44 = vpop.f32.mrf.mxu0 }
  0xde   : > { %v1047_v47 = vpop.f32.mrf.mxu1 }
  0xdf   : > { %v1048_v50 = vadd.f32 %v1047_v47, %v636_v44  ;;  %v2596_v47 = vld [vmem:[%s2902_s27 + $0x90] sm:$0xff] }
  0xe0   : > { %2106 = vmatmul.msk.bf16.gmra.mxu0 %vm514_vm0, %v2592_v42  ;;  %2294 = vmatmul.msk.bf16.gmra.mxu3 %vm514_vm0, %v2573_v43 }
  0xe1   : > { %2278 = vmatmul.msk.bf16.gmra.mxu1 %vm514_vm0, %v2557_v45 }
  0xe2   : > { %2520 = vmatmul.msk.bf16.gmra.mxu2 %vm514_vm0, %v2627_v46 }
  0xe3   : > { %v3044_v51 = vpop.f32.mrf.mxu3 }
  0xe5   : > { %v1534_v52 = vpop.f32.mrf.mxu2  ;;  %v638_v54 = vpop.f32.mrf.mxu0 }
  0xe6   : > { %v1650_v53 = vadd.f32 %v1534_v52, %v1048_v50  ;;  %v1049_v55 = vpop.f32.mrf.mxu1  ;;  %v2639_v50 = vld [vmem:[%s2902_s27 + $0xe0] sm:$0xff] }
  0xe7   : > { %v1050_v59 = vadd.f32 %v1049_v55, %v638_v54  ;;  %v2631_v54 = vld [vmem:[%s2902_s27 + $0xa0] sm:$0xff] }
  0xe8   : > { %v1686_v56 = vadd.f32 %v2988_v49, %v1650_v53  ;;  %v2561_v53 = vld [vmem:[%s2902_s27 + $0x80] sm:$0xff] }
  0xea   : > { %v1718_v58 = vmax.f32 %v1686_v56, 0.0 }
  0xeb   : > { %v3049_v60 = vpop.f32.mrf.mxu3 }
  0xec   : > { %1751 = vst.msk [vmem:[%s2993_s9 + $0x20] sm:$0xff] %vm1746_vm1, %v1718_v58 }
  0xed   : > { %v1536_v61 = vpop.f32.mrf.mxu2  ;;  %v641_v1 = vpop.f32.mrf.mxu0 }
  0xee   : > { %v1651_v0 = vadd.f32 %v1536_v61, %v1050_v59  ;;  %v1052_v4 = vpop.f32.mrf.mxu1 }
  0xf0   : > { %v1687_v5 = vadd.f32 %v2988_v49, %v1651_v0  ;;  %2107 = vmatmul.msk.bf16.gmra.mxu0 %vm514_vm0, %v2593_v62  ;;  %2295 = vmatmul.msk.bf16.gmra.mxu3 %vm514_vm0, %v2574_v63 }
  0xf1   : > { %2279 = vmatmul.msk.bf16.gmra.mxu1 %vm514_vm0, %v2558_v2 }
  0xf2   : > { %v1719_v6 = vmax.f32 %v1687_v5, 0.0  ;;  %2521 = vmatmul.msk.bf16.gmra.mxu2 %vm514_vm0, %v2628_v3  ;;  %v2597_v5 = vld [vmem:[%s2902_s27 + $0x98] sm:$0xff] }
  0xf3   : > { %v737_v7 = vpop.f32.mrf.mxu3 }
  0xf4   : > { %1752 = vst.msk [vmem:[%s2993_s9 + $0x28] sm:$0xff] %vm1746_vm1, %v1719_v6  ;;  %v2640_v6 = vld [vmem:[%s2902_s27 + $0xe8] sm:$0xff] }
  0xf5   : > { %v1539_v8 = vpop.f32.mrf.mxu2  ;;  %v642_v9 = vpop.f32.mrf.mxu0 }
  0xf6   : > { %v1053_v10 = vpop.f32.mrf.mxu1  ;;  %v2562_v9 = vld [vmem:[%s2902_s27 + $0x88] sm:$0xff] }
  0xf7   : > { %v2632_v10 = vld [vmem:[%s2902_s27 + $0xa8] sm:$0xff] }
  0xfb   : > { %v738_v11 = vpop.f32.mrf.mxu3 }
  0xfd   : > { %v1540_v12 = vpop.f32.mrf.mxu2  ;;  %v644_v15 = vpop.f32.mrf.mxu0 }
  0xfe   : > { %v1055_v19 = vpop.f32.mrf.mxu1 }
  0xff   : > { %v1056_v20 = vadd.f32 %v1055_v19, %v644_v15 }
 0x100   : > { %2108 = vmatmul.msk.bf16.gmra.mxu0 %vm514_vm0, %v2594_v13  ;;  %2296 = vmatmul.msk.bf16.gmra.mxu3 %vm514_vm0, %v2575_v14 }
 0x101   : > { %2280 = vmatmul.msk.bf16.gmra.mxu1 %vm514_vm0, %v2559_v16 }
 0x102   : > { %2522 = vmatmul.msk.bf16.gmra.mxu2 %vm514_vm0, %v2629_v18 }
 0x103   : > { %v3070_v21 = vpop.f32.mrf.mxu3 }
 0x105   : > { %v1542_v22 = vpop.f32.mrf.mxu2  ;;  %v646_v24 = vpop.f32.mrf.mxu0 }
 0x106   : > { %v1652_v23 = vadd.f32 %v1542_v22, %v1056_v20  ;;  %v1057_v26 = vpop.f32.mrf.mxu1  ;;  %v2598_v22 = vld [vmem:[%s2902_s27 + $0xa0] sm:$0xff] }
 0x107   : > { %v1058_v29 = vadd.f32 %v1057_v26, %v646_v24  ;;  %v2563_v26 = vld [vmem:[%s2902_s27 + $0x90] sm:$0xff] }
 0x108   : > { %v1688_v27 = vadd.f32 %v2988_v49, %v1652_v23  ;;  %v2641_v23 = vld [vmem:[%s2902_s27 + $0xf0] sm:$0xff] }
 0x10a   : > { %v1720_v28 = vmax.f32 %v1688_v27, 0.0  ;;  %v2633_v27 = vld [vmem:[%s2902_s27 + $0xb0] sm:$0xff] }
 0x10b   : > { %v3075_v30 = vpop.f32.mrf.mxu3 }
 0x10c   : > { %1753 = vst.msk [vmem:[%s2993_s9 + $0x30] sm:$0xff] %vm1746_vm1, %v1720_v28 }
 0x10d   : > { %v1544_v31 = vpop.f32.mrf.mxu2  ;;  %v649_v35 = vpop.f32.mrf.mxu0 }
 0x10e   : > { %v1653_v34 = vadd.f32 %v1544_v31, %v1058_v29  ;;  %v1060_v38 = vpop.f32.mrf.mxu1 }
 0x110   : > { %v1689_v39 = vadd.f32 %v2988_v49, %v1653_v34  ;;  %2109 = vmatmul.msk.bf16.gmra.mxu0 %vm514_vm0, %v2595_v32  ;;  %2297 = vmatmul.msk.bf16.gmra.mxu3 %vm514_vm0, %v2576_v33 }
 0x111   : > { %2281 = vmatmul.msk.bf16.gmra.mxu1 %vm514_vm0, %v2560_v36 }
 0x112   : > { %v1721_v40 = vmax.f32 %v1689_v39, 0.0  ;;  %2523 = vmatmul.msk.bf16.gmra.mxu2 %vm514_vm0, %v2630_v37 }
 0x113   : > { %v745_v41 = vpop.f32.mrf.mxu3 }
 0x114   : > { %1754 = vst.msk [vmem:[%s2993_s9 + $0x38] sm:$0xff] %vm1746_vm1, %v1721_v40  ;;  %v2599_v41 = vld [vmem:[%s2902_s27 + $0xa8] sm:$0xff] }
 0x115   : > { %v1547_v42 = vpop.f32.mrf.mxu2  ;;  %v650_v43 = vpop.f32.mrf.mxu0 }
 0x116   : > { %v1061_v44 = vpop.f32.mrf.mxu1  ;;  %v2642_v42 = vld [vmem:[%s2902_s27 + $0xf8] sm:$0xff] }
 0x11b   : > { %v746_v45 = vpop.f32.mrf.mxu3 }
 0x11c   : > { %v2564_v45 = vld [vmem:[%s2902_s27 + $0x98] sm:$0xff] }
 0x11d   : > { %v1548_v46 = vpop.f32.mrf.mxu2  ;;  %v652_v52 = vpop.f32.mrf.mxu0 }
 0x11e   : > { %v1063_v55 = vpop.f32.mrf.mxu1  ;;  %v2634_v46 = vld [vmem:[%s2902_s27 + $0xb8] sm:$0xff] }
 0x11f   : > { %v1064_v56 = vadd.f32 %v1063_v55, %v652_v52 }
 0x120   : > { %2110 = vmatmul.msk.bf16.gmra.mxu0 %vm514_vm0, %v2596_v47  ;;  %2532 = vmatmul.msk.bf16.vlgmr.msra.gmra.mxu3 %vm514_vm0, %v2639_v50 }
 0x121   : > { %2282 = vmatmul.msk.bf16.gmra.mxu1 %vm514_vm0, %v2561_v53 }
 0x122   : > { %2524 = vmatmul.msk.bf16.gmra.mxu2 %vm514_vm0, %v2631_v54 }
 0x123   : > { %v3096_v58 = vpop.f32.mrf.mxu3 }
 0x125   : > { %v1550_v59 = vpop.f32.mrf.mxu2  ;;  %v654_v62 = vpop.f32.mrf.mxu0 }
 0x126   : > { %v1654_v61 = vadd.f32 %v1550_v59, %v1064_v56  ;;  %v1065_v63 = vpop.f32.mrf.mxu1 }
 0x127   : > { %v1066_v2 = vadd.f32 %v1065_v63, %v654_v62  ;;  %v2600_v62 = vld [vmem:[%s2902_s27 + $0xb0] sm:$0xff]  ;;  %v2643_v63 = vld [vmem:[%s2902_s27 + $0x100] sm:$0xff] }
 0x128   : > { %v1690_v0 = vadd.f32 %v2988_v49, %v1654_v61 }
 0x12a   : > { %v1722_v1 = vmax.f32 %v1690_v0, 0.0 }
 0x12b   : > { %v3101_v3 = vpop.f32.mrf.mxu3 }
 0x12c   : > { %1755 = vst.msk [vmem:[%s2993_s9 + $0x40] sm:$0xff] %vm1746_vm1, %v1722_v1  ;;  %v2565_v1 = vld [vmem:[%s2902_s27 + $0xa0] sm:$0xff] }
 0x12d   : > { %v1552_v4 = vpop.f32.mrf.mxu2  ;;  %v657_v8 = vpop.f32.mrf.mxu0 }
 0x12e   : > { %v1655_v7 = vadd.f32 %v1552_v4, %v1066_v2  ;;  %v1068_v11 = vpop.f32.mrf.mxu1  ;;  %v2635_v2 = vld [vmem:[%s2902_s27 + $0xc0] sm:$0xff] }
 0x130   : > { %v1691_v12 = vadd.f32 %v2988_v49, %v1655_v7  ;;  %2111 = vmatmul.msk.bf16.gmra.mxu0 %vm514_vm0, %v2597_v5  ;;  %2533 = vmatmul.msk.bf16.gmra.mxu3 %vm514_vm0, %v2640_v6 }
 0x131   : > { %2283 = vmatmul.msk.bf16.gmra.mxu1 %vm514_vm0, %v2562_v9 }
 0x132   : > { %v1723_v13 = vmax.f32 %v1691_v12, 0.0  ;;  %2525 = vmatmul.msk.bf16.gmra.mxu2 %vm514_vm0, %v2632_v10 }
 0x133   : > { %v1132_v14 = vpop.f32.mrf.mxu3 }
 0x134   : > { %1756 = vst.msk [vmem:[%s2993_s9 + $0x48] sm:$0xff] %vm1746_vm1, %v1723_v13 }
 0x135   : > { %v1555_v15 = vpop.f32.mrf.mxu2  ;;  %v658_v16 = vpop.f32.mrf.mxu0 }
 0x136   : > { %v1069_v18 = vpop.f32.mrf.mxu1  ;;  %v2601_v16 = vld [vmem:[%s2902_s27 + $0xb8] sm:$0xff] }
 0x137   : > { %v2644_v18 = vld [vmem:[%s2902_s27 + $0x108] sm:$0xff] }
 0x13b   : > { %v1133_v19 = vpop.f32.mrf.mxu3 }
 0x13d   : > { %v1556_v20 = vpop.f32.mrf.mxu2  ;;  %v660_v24 = vpop.f32.mrf.mxu0 }
 0x13e   : > { %v1071_v28 = vpop.f32.mrf.mxu1 }
 0x13f   : > { %v1072_v29 = vadd.f32 %v1071_v28, %v660_v24 }
 0x140   : > { %2112 = vmatmul.msk.bf16.gmra.mxu0 %vm514_vm0, %v2598_v22  ;;  %2534 = vmatmul.msk.bf16.gmra.mxu3 %vm514_vm0, %v2641_v23  ;;  %v2566_v22 = vld [vmem:[%s2902_s27 + $0xa8] sm:$0xff] }
 0x141   : > { %2284 = vmatmul.msk.bf16.gmra.mxu1 %vm514_vm0, %v2563_v26  ;;  %v2636_v23 = vld [vmem:[%s2902_s27 + $0xc8] sm:$0xff] }
 0x142   : > { %2526 = vmatmul.msk.bf16.gmra.mxu2 %vm514_vm0, %v2633_v27 }
 0x143   : > { %v3122_v31 = vpop.f32.mrf.mxu3 }
 0x145   : > { %v1558_v32 = vpop.f32.mrf.mxu2  ;;  %v662_v34 = vpop.f32.mrf.mxu0 }
 0x146   : > { %v1656_v33 = vadd.f32 %v1558_v32, %v1072_v29  ;;  %v1073_v35 = vpop.f32.mrf.mxu1 }
 0x147   : > { %v1074_v38 = vadd.f32 %v1073_v35, %v662_v34 }
 0x148   : > { %v1692_v36 = vadd.f32 %v2988_v49, %v1656_v33 }
 0x14a   : > { %v1724_v37 = vmax.f32 %v1692_v36, 0.0  ;;  %v2602_v36 = vld [vmem:[%s2902_s27 + $0xc0] sm:$0xff] }
 0x14b   : > { %v3127_v39 = vpop.f32.mrf.mxu3 }
 0x14c   : > { %1757 = vst.msk [vmem:[%s2993_s9 + $0x50] sm:$0xff] %vm1746_vm1, %v1724_v37  ;;  %v2645_v37 = vld [vmem:[%s2902_s27 + $0x110] sm:$0xff] }
 0x14d   : > { %v1560_v40 = vpop.f32.mrf.mxu2  ;;  %v665_v44 = vpop.f32.mrf.mxu0 }
 0x14e   : > { %v1657_v43 = vadd.f32 %v1560_v40, %v1074_v38  ;;  %v1076_v47 = vpop.f32.mrf.mxu1  ;;  %v2567_v40 = vld [vmem:[%s2902_s27 + $0xb0] sm:$0xff] }
 0x150   : > { %v1693_v50 = vadd.f32 %v2988_v49, %v1657_v43  ;;  %2113 = vmatmul.msk.bf16.gmra.mxu0 %vm514_vm0, %v2599_v41  ;;  %2535 = vmatmul.msk.bf16.gmra.mxu3 %vm514_vm0, %v2642_v42  ;;  %v2637_v41 = vld [vmem:[%s2902_s27 + $0xd0] sm:$0xff] }
 0x151   : > { %2285 = vmatmul.msk.bf16.gmra.mxu1 %vm514_vm0, %v2564_v45 }
 0x152   : > { %v1725_v52 = vmax.f32 %v1693_v50, 0.0  ;;  %2527 = vmatmul.msk.bf16.gmra.mxu2 %vm514_vm0, %v2634_v46 }
 0x153   : > { %v1140_v53 = vpop.f32.mrf.mxu3 }
 0x154   : > { %1758 = vst.msk [vmem:[%s2993_s9 + $0x58] sm:$0xff] %vm1746_vm1, %v1725_v52 }
 0x155   : > { %v1563_v54 = vpop.f32.mrf.mxu2  ;;  %v666_v55 = vpop.f32.mrf.mxu0 }
 0x156   : > { %v1077_v56 = vpop.f32.mrf.mxu1 }
 0x15b   : > { %v1141_v59 = vpop.f32.mrf.mxu3 }
 0x15c   : > { %v2603_v59 = vld [vmem:[%s2902_s27 + $0xc8] sm:$0xff] }
 0x15d   : > { %v1564_v61 = vpop.f32.mrf.mxu2  ;;  %v668_v0 = vpop.f32.mrf.mxu0 }
 0x15e   : > { %v1079_v4 = vpop.f32.mrf.mxu1  ;;  %v2646_v61 = vld [vmem:[%s2902_s27 + $0x118] sm:$0xff] }
 0x15f   : > { %v1080_v5 = vadd.f32 %v1079_v4, %v668_v0  ;;  %v2568_v0 = vld [vmem:[%s2902_s27 + $0xb8] sm:$0xff] }
 0x160   : > { %2114 = vmatmul.msk.bf16.gmra.mxu0 %vm514_vm0, %v2600_v62  ;;  %2536 = vmatmul.msk.bf16.gmra.mxu3 %vm514_vm0, %v2643_v63 }
 0x161   : > { %2286 = vmatmul.msk.bf16.gmra.mxu1 %vm514_vm0, %v2565_v1  ;;  %v2638_v1 = vld [vmem:[%s2902_s27 + $0xd8] sm:$0xff]  ;;  %s2735_s27 = scalar_lea.hbm %s2734_s26, 256 }
 0x162   : > { %2528 = vmatmul.msk.bf16.gmra.mxu2 %vm514_vm0, %v2635_v2  ;;  %p2736_p12 = scmp.ne.s32.totalorder %s2734_s26, %s2735_s27  ;;  %p2741_p2 = scmp.lt.s32.totalorder %s2739_s30, %s2735_s27 }
 0x163   : > { %v3148_v6 = vpop.f32.mrf.mxu3 }
 0x164   : > { %p2737_p13 = pnand %p2736_p12, %p2861_p4  ;;  %p2742_p3 = por %p2741_p2, %p2740_p1 }
 0x165   : > { %v1566_v7 = vpop.f32.mrf.mxu2  ;;  %v670_v9 = vpop.f32.mrf.mxu0 }
 0x166   : > { %v1658_v8 = vadd.f32 %v1566_v7, %v1080_v5  ;;  %v1081_v10 = vpop.f32.mrf.mxu1  ;;  %p2738_p0 = pneg %p2737_p13 }
 0x167   : > { %v1082_v13 = vadd.f32 %v1081_v10, %v670_v9 }
 0x168   : > { %v1694_v11 = vadd.f32 %v2988_v49, %v1658_v8  ;;  %p2743_p5 = pnand %p2742_p3, %p2738_p0 }
 0x16a   : > { %v1726_v12 = vmax.f32 %v1694_v11, 0.0 }
 0x16b   : > { %v3153_v14 = vpop.f32.mrf.mxu3 }
 0x16c   : > { %1759 = vst.msk [vmem:[%s2993_s9 + $0x60] sm:$0xff] %vm1746_vm1, %v1726_v12 }
 0x16d   : > { %v1568_v15 = vpop.f32.mrf.mxu2  ;;  %v673_v20 = vpop.f32.mrf.mxu0 }
 0x16e   : > { %v1659_v19 = vadd.f32 %v1568_v15, %v1082_v13  ;;  %v1084_v24 = vpop.f32.mrf.mxu1 }
 0x170   : > { %v1695_v26 = vadd.f32 %v2988_v49, %v1659_v19  ;;  %2115 = vmatmul.msk.bf16.gmra.mxu0 %vm514_vm0, %v2601_v16  ;;  %2537 = vmatmul.msk.bf16.gmra.mxu3 %vm514_vm0, %v2644_v18  ;;  %v1128_v18 = vadd.f32 %v3096_v58, %v2983_v48 }
 0x171   : > { %2287 = vmatmul.msk.bf16.gmra.mxu1 %vm514_vm0, %v2566_v22 }
 0x172   : > { %v1727_v27 = vmax.f32 %v1695_v26, 0.0  ;;  %2529 = vmatmul.msk.bf16.gmra.mxu2 %vm514_vm0, %v2636_v23 }
 0x173   : > { %v1148_v28 = vpop.f32.mrf.mxu3 }
 0x174   : > { %1760 = vst.msk [vmem:[%s2993_s9 + $0x68] sm:$0xff] %vm1746_vm1, %v1727_v27 }
 0x175   : > { %v1571_v29 = vpop.f32.mrf.mxu2  ;;  %v674_v32 = vpop.f32.mrf.mxu0 }
 0x176   : > { %v1085_v33 = vpop.f32.mrf.mxu1 }
 0x177   : > { %v1130_v33 = vadd.f32 %v3101_v3, %v2997_v57 }
 0x17b   : > { %v1149_v34 = vpop.f32.mrf.mxu3 }
 0x17d   : > { %v1572_v35 = vpop.f32.mrf.mxu2  ;;  %v676_v38 = vpop.f32.mrf.mxu0 }
 0x17e   : > { %v1087_v42 = vpop.f32.mrf.mxu1 }
 0x17f   : > { %v1088_v43 = vadd.f32 %v1087_v42, %v676_v38 }
 0x180   : > { %2116 = vmatmul.msk.bf16.gmra.mxu0 %vm514_vm0, %v2602_v36  ;;  %2538 = vmatmul.msk.bf16.gmra.mxu3 %vm514_vm0, %v2645_v37 }
 0x181   : > { %2288 = vmatmul.msk.bf16.gmra.mxu1 %vm514_vm0, %v2567_v40 }
 0x182   : > { %2530 = vmatmul.msk.bf16.gmra.mxu2 %vm514_vm0, %v2637_v41 }
 0x183   : > { %v3174_v44 = vpop.f32.mrf.mxu3 }
 0x185   : > { %v1574_v45 = vpop.f32.mrf.mxu2  ;;  %v678_v47 = vpop.f32.mrf.mxu0 }
 0x186   : > { %v1660_v46 = vadd.f32 %v1574_v45, %v1088_v43  ;;  %v1089_v50 = vpop.f32.mrf.mxu1 }
 0x187   : > { %v1090_v54 = vadd.f32 %v1089_v50, %v678_v47 }
 0x188   : > { %v1696_v52 = vadd.f32 %v2988_v49, %v1660_v46 }
 0x18a   : > { %v1728_v53 = vmax.f32 %v1696_v52, 0.0 }
 0x18b   : > { %v3179_v55 = vpop.f32.mrf.mxu3 }
 0x18c   : > { %1761 = vst.msk [vmem:[%s2993_s9 + $0x70] sm:$0xff] %vm1746_vm1, %v1728_v53 }
 0x18d   : > { %v1576_v56 = vpop.f32.mrf.mxu2  ;;  %v681_v63 = vpop.f32.mrf.mxu0 }
 0x18e   : > { %v1661_v62 = vadd.f32 %v1576_v56, %v1090_v54  ;;  %v1092_v2 = vpop.f32.mrf.mxu1  ;;  %v1136_v56 = vadd.f32 %v3122_v31, %v3018_v17 }
 0x190   : > { %v1697_v4 = vadd.f32 %v2988_v49, %v1661_v62  ;;  %2117 = vmatmul.msk.bf16.gmra.mxu0 %vm514_vm0, %v2603_v59  ;;  %2539 = vmatmul.msk.bf16.gmra.mxu3 %vm514_vm0, %v2646_v61 }
 0x191   : > { %2289 = vmatmul.msk.bf16.gmra.mxu1 %vm514_vm0, %v2568_v0 }
 0x192   : > { %v1729_v5 = vmax.f32 %v1697_v4, 0.0  ;;  %2531 = vmatmul.msk.bf16.gmra.mxu2 %vm514_vm0, %v2638_v1 }
 0x193   : > { %v1156_v7 = vpop.f32.mrf.mxu3 }
 0x194   : > { %1762 = vst.msk [vmem:[%s2993_s9 + $0x78] sm:$0xff] %vm1746_vm1, %v1729_v5 }
 0x195   : > { %v1579_v8 = vpop.f32.mrf.mxu2  ;;  %v682_v9 = vpop.f32.mrf.mxu0 }
 0x196   : > { %v1093_v10 = vpop.f32.mrf.mxu1  ;;  %v1138_v8 = vadd.f32 %v3127_v39, %v3023_v25 }
 0x19b   : > { %v1157_v11 = vpop.f32.mrf.mxu3 }
 0x19d   : > { %v1580_v12 = vpop.f32.mrf.mxu2  ;;  %v684_v13 = vpop.f32.mrf.mxu0 }
 0x19e   : > { %v1095_v15 = vpop.f32.mrf.mxu1 }
 0x19f   : > { %v1096_v16 = vadd.f32 %v1095_v15, %v684_v13 }
 0x1a3   : > { %v1614_v19 = vpop.f32.mrf.mxu3 }
 0x1a4   : > { %v1670_v22 = vadd.f32 %v1614_v19, %v1128_v18 }
 0x1a5   : > { %v1582_v20 = vpop.f32.mrf.mxu2  ;;  %v686_v24 = vpop.f32.mrf.mxu0 }
 0x1a6   : > { %v1662_v23 = vadd.f32 %v1582_v20, %v1096_v16  ;;  %v1706_v26 = vadd.f32 %v2988_v49, %v1670_v22  ;;  %v1097_v27 = vpop.f32.mrf.mxu1 }
 0x1a7   : > { %v1098_v48 = vadd.f32 %v1097_v27, %v686_v24 }
 0x1a8   : > { %v1698_v28 = vadd.f32 %v2988_v49, %v1662_v23  ;;  %v1738_v29 = vmax.f32 %v1706_v26, 0.0 }
 0x1aa   : > { %v1730_v32 = vmax.f32 %v1698_v28, 0.0  ;;  %1771 = vst.msk [vmem:[%s2993_s9 + $0xc0] sm:$0xff] %vm1746_vm1, %v1738_v29  ;;  %v1144_v29 = vadd.f32 %v3148_v6, %v3044_v51 }
 0x1ab   : > { %v1616_v58 = vpop.f32.mrf.mxu3 }
 0x1ac   : > { %1763 = vst.msk [vmem:[%s2993_s9 + $0x80] sm:$0xff] %vm1746_vm1, %v1730_v32  ;;  %v1671_v35 = vadd.f32 %v1616_v58, %v1130_v33 }
 0x1ad   : > { %v1584_v34 = vpop.f32.mrf.mxu2  ;;  %v689_v37 = vpop.f32.mrf.mxu0 }
 0x1ae   : > { %v1663_v36 = vadd.f32 %v1584_v34, %v1098_v48  ;;  %v1707_v38 = vadd.f32 %v2988_v49, %v1671_v35  ;;  %v1100_v40 = vpop.f32.mrf.mxu1 }
 0x1b0   : > { %v1699_v41 = vadd.f32 %v2988_v49, %v1663_v36  ;;  %v1739_v42 = vmax.f32 %v1707_v38, 0.0 }
 0x1b2   : > { %v1731_v43 = vmax.f32 %v1699_v41, 0.0  ;;  %1772 = vst.msk [vmem:[%s2993_s9 + $0xc8] sm:$0xff] %vm1746_vm1, %v1739_v42  ;;  %v1146_v41 = vadd.f32 %v3153_v14, %v3049_v60 }
 0x1b3   : > { %v1619_v57 = vpop.f32.mrf.mxu3 }
 0x1b4   : > { %1764 = vst.msk [vmem:[%s2993_s9 + $0x88] sm:$0xff] %vm1746_vm1, %v1731_v43 }
 0x1b5   : > { %v1587_v3 = vpop.f32.mrf.mxu2  ;;  %v690_v45 = vpop.f32.mrf.mxu0 }
 0x1b6   : > { %v1101_v46 = vpop.f32.mrf.mxu1 }
 0x1bb   : > { %v1620_v47 = vpop.f32.mrf.mxu3 }
 0x1bd   : > { %v1588_v50 = vpop.f32.mrf.mxu2  ;;  %v692_v52 = vpop.f32.mrf.mxu0 }
 0x1be   : > { %v1103_v53 = vpop.f32.mrf.mxu1 }
 0x1bf   : > { %v1104_v54 = vadd.f32 %v1103_v53, %v692_v52 }
 0x1c3   : > { %v1622_v59 = vpop.f32.mrf.mxu3 }
 0x1c4   : > { %v1672_v62 = vadd.f32 %v1622_v59, %v1136_v56 }
 0x1c5   : > { %v1590_v61 = vpop.f32.mrf.mxu2  ;;  %v694_v0 = vpop.f32.mrf.mxu0 }
 0x1c6   : > { %v1664_v63 = vadd.f32 %v1590_v61, %v1104_v54  ;;  %v1708_v1 = vadd.f32 %v2988_v49, %v1672_v62  ;;  %v1105_v2 = vpop.f32.mrf.mxu1 }
 0x1c7   : > { %v1106_v17 = vadd.f32 %v1105_v2, %v694_v0  ;;  %v1152_v0 = vadd.f32 %v3174_v44, %v3070_v21 }
 0x1c8   : > { %v1700_v4 = vadd.f32 %v2988_v49, %v1664_v63  ;;  %v1740_v5 = vmax.f32 %v1708_v1, 0.0 }
 0x1ca   : > { %v1732_v7 = vmax.f32 %v1700_v4, 0.0  ;;  %1773 = vst.msk [vmem:[%s2993_s9 + $0xd0] sm:$0xff] %vm1746_vm1, %v1740_v5 }
 0x1cb   : > { %v1624_v31 = vpop.f32.mrf.mxu3 }
 0x1cc   : > { %1765 = vst.msk [vmem:[%s2993_s9 + $0x90] sm:$0xff] %vm1746_vm1, %v1732_v7  ;;  %v1673_v10 = vadd.f32 %v1624_v31, %v1138_v8 }
 0x1cd   : > { %v1592_v9 = vpop.f32.mrf.mxu2  ;;  %v697_v12 = vpop.f32.mrf.mxu0 }
 0x1ce   : > { %v1665_v11 = vadd.f32 %v1592_v9, %v1106_v17  ;;  %v1709_v13 = vadd.f32 %v2988_v49, %v1673_v10  ;;  %v1108_v15 = vpop.f32.mrf.mxu1 }
 0x1d0   : > { %v1701_v16 = vadd.f32 %v2988_v49, %v1665_v11  ;;  %v1741_v18 = vmax.f32 %v1709_v13, 0.0  ;;  %v1154_v11 = vadd.f32 %v3179_v55, %v3075_v30 }
 0x1d2   : > { %v1733_v19 = vmax.f32 %v1701_v16, 0.0  ;;  %1774 = vst.msk [vmem:[%s2993_s9 + $0xd8] sm:$0xff] %vm1746_vm1, %v1741_v18 }
 0x1d3   : > { %v1627_v25 = vpop.f32.mrf.mxu3 }
 0x1d4   : > { %1766 = vst.msk [vmem:[%s2993_s9 + $0x98] sm:$0xff] %vm1746_vm1, %v1733_v19 }
 0x1d5   : > { %v1595_v39 = vpop.f32.mrf.mxu2  ;;  %v698_v20 = vpop.f32.mrf.mxu0 }
 0x1d6   : > { %v1109_v22 = vpop.f32.mrf.mxu1 }
 0x1db   : > { %v1628_v23 = vpop.f32.mrf.mxu3 }
 0x1dd   : > { %v1596_v24 = vpop.f32.mrf.mxu2  ;;  %v700_v26 = vpop.f32.mrf.mxu0 }
 0x1de   : > { %v1111_v27 = vpop.f32.mrf.mxu1 }
 0x1df   : > { %v1112_v28 = vadd.f32 %v1111_v27, %v700_v26 }
 0x1e3   : > { %v1630_v32 = vpop.f32.mrf.mxu3 }
 0x1e4   : > { %v1674_v48 = vadd.f32 %v1630_v32, %v1144_v29 }
 0x1e5   : > { %v1598_v33 = vpop.f32.mrf.mxu2  ;;  %v702_v34 = vpop.f32.mrf.mxu0 }
 0x1e6   : > { %v1666_v58 = vadd.f32 %v1598_v33, %v1112_v28  ;;  %v1710_v35 = vadd.f32 %v2988_v49, %v1674_v48  ;;  %v1113_v36 = vpop.f32.mrf.mxu1 }
 0x1e7   : > { %v1114_v51 = vadd.f32 %v1113_v36, %v702_v34 }
 0x1e8   : > { %v1702_v37 = vadd.f32 %v2988_v49, %v1666_v58  ;;  %v1742_v38 = vmax.f32 %v1710_v35, 0.0 }
 0x1ea   : > { %v1734_v40 = vmax.f32 %v1702_v37, 0.0  ;;  %1775 = vst.msk [vmem:[%s2993_s9 + $0xe0] sm:$0xff] %vm1746_vm1, %v1742_v38 }
 0x1eb   : > { %v1632_v6 = vpop.f32.mrf.mxu3 }
 0x1ec   : > { %1767 = vst.msk [vmem:[%s2993_s9 + $0xa0] sm:$0xff] %vm1746_vm1, %v1734_v40  ;;  %v1675_v43 = vadd.f32 %v1632_v6, %v1146_v41 }
 0x1ed   : > { %v1600_v42 = vpop.f32.mrf.mxu2  ;;  %v705_v3 = vpop.f32.mrf.mxu0 }
 0x1ee   : > { %v1667_v57 = vadd.f32 %v1600_v42, %v1114_v51  ;;  %v1711_v45 = vadd.f32 %v2988_v49, %v1675_v43  ;;  %v1116_v46 = vpop.f32.mrf.mxu1 }
 0x1f0   : > { %v1703_v47 = vadd.f32 %v2988_v49, %v1667_v57  ;;  %v1743_v50 = vmax.f32 %v1711_v45, 0.0 }
 0x1f2   : > { %v1735_v52 = vmax.f32 %v1703_v47, 0.0  ;;  %1776 = vst.msk [vmem:[%s2993_s9 + $0xe8] sm:$0xff] %vm1746_vm1, %v1743_v50 }
 0x1f3   : > { %v1635_v60 = vpop.f32.mrf.mxu3 }
 0x1f4   : > { %1768 = vst.msk [vmem:[%s2993_s9 + $0xa8] sm:$0xff] %vm1746_vm1, %v1735_v52 }
 0x1f5   : > { %v1603_v14 = vpop.f32.mrf.mxu2  ;;  %v706_v53 = vpop.f32.mrf.mxu0 }
 0x1f6   : > { %v1117_v54 = vpop.f32.mrf.mxu1 }
 0x1fb   : > { %v1636_v56 = vpop.f32.mrf.mxu3 }
 0x1fd   : > { %v1604_v59 = vpop.f32.mrf.mxu2  ;;  %v708_v61 = vpop.f32.mrf.mxu0 }
 0x1fe   : > { %v1119_v62 = vpop.f32.mrf.mxu1 }
 0x1ff   : > { %v1120_v63 = vadd.f32 %v1119_v62, %v708_v61 }
 0x203   : > { %v1638_v1 = vpop.f32.mrf.mxu3 }
 0x204   : > { %v1676_v4 = vadd.f32 %v1638_v1, %v1152_v0 }
 0x205   : > { %v1606_v2 = vpop.f32.mrf.mxu2  ;;  %v710_v7 = vpop.f32.mrf.mxu0 }
 0x206   : > { %v1668_v5 = vadd.f32 %v1606_v2, %v1120_v63  ;;  %v1712_v8 = vadd.f32 %v2988_v49, %v1676_v4  ;;  %v1121_v17 = vpop.f32.mrf.mxu1 }
 0x207   : > { %v1122_v21 = vadd.f32 %v1121_v17, %v710_v7 }
 0x208   : > { %v1704_v31 = vadd.f32 %v2988_v49, %v1668_v5  ;;  %v1744_v9 = vmax.f32 %v1712_v8, 0.0 }
 0x20a   : > { %v1736_v10 = vmax.f32 %v1704_v31, 0.0  ;;  %1777 = vst.msk [vmem:[%s2993_s9 + $0xf0] sm:$0xff] %vm1746_vm1, %v1744_v9 }
 0x20b   : > { %v1640_v44 = vpop.f32.mrf.mxu3 }
 0x20c   : > { %1769 = vst.msk [vmem:[%s2993_s9 + $0xb0] sm:$0xff] %vm1746_vm1, %v1736_v10  ;;  %v1677_v13 = vadd.f32 %v1640_v44, %v1154_v11 }
 0x20d   : > { %v1608_v12 = vpop.f32.mrf.mxu2  ;;  %v713_v16 = vpop.f32.mrf.mxu0 }
 0x20e   : > { %v1669_v15 = vadd.f32 %v1608_v12, %v1122_v21  ;;  %v1713_v30 = vadd.f32 %v2988_v49, %v1677_v13  ;;  %v1124_v55 = vpop.f32.mrf.mxu1 }
 0x210   : > { %v1705_v18 = vadd.f32 %v2988_v49, %v1669_v15  ;;  %v1745_v19 = vmax.f32 %v1713_v30, 0.0 }
 0x212   : > { %v1737_v25 = vmax.f32 %v1705_v18, 0.0  ;;  %1778 = vst.msk [vmem:[%s2993_s9 + $0xf8] sm:$0xff] %vm1746_vm1, %v1745_v19 }
 0x213   : > { %v1643_v39 = vpop.f32.mrf.mxu3 }
 0x214   : > { %1770 = vst.msk [vmem:[%s2993_s9 + $0xb8] sm:$0xff] %vm1746_vm1, %v1737_v25 }
 0x215   : > { %v1611_v20 = vpop.f32.mrf.mxu2 }
 0x216   : > { %2746 = shalt.err (!%p2743_p5)
}
 0x217   : > { %s2799_s5 = smov 128   ;;  %s2800_s7 = smov 8   ;;  %v714_v49 = vpop.f32.mrf.mxu0  ;;  %v1125_v22 = vpop.f32.mrf.mxu1 }
 0x218   : > { %2661 = dma.vmem_to_hbm [thread:$0]  (%p2861_p4), %s1796_s15, 4096, %s1798_s21, %s1780_s23, %s2799_s5, %s2799_s5, %s2800_s7  }
 0x21b   : > { %v1644_v23 = vpop.f32.mrf.mxu3 }
 0x21d   : > { %v1612_v24 = vpop.f32.mrf.mxu2 }
 0x21e PF: > { %p2667_p6 = scmp.ge.s32.totalorder %s2797_s17, 2  ;;  %s1812_s8 = sand.u32 1, %s2777_s12  }
 0x21f   : > { %s1813_s9 = scalar_lea.sflag [#allocation3], %s1812_s8 }
 0x220   : > { %p2664_p7 = pnand %p2667_p6, %p2868_p8 }
 0x222   : > { %p2665_p9 = pneg %p2664_p7 }
 0x224   : > { %2772 = dma.done.wait (%p2665_p9), %s1813_s9, 4096  }
 0x225   : > { %2774 = vsyncadd (%p2665_p9), %s1813_s9, 4294963200  ;;  %s16_s17 = sadd.s32 1, %s2797_s17   ;;  %s3301_s12 = smov %s2781_s13 }
 0x226   : > { %p13_p10 = scmp.ge.s32.totalorder %s16_s17, 4   ;;  %s3302_s13 = smov %s2785_s14 }
 0x227   : > { %s3303_s14 = smov %s2874_s25  ;;  %s3304_s15 = smov %s2793_s16 }
 0x228   : > { %s3305_s16 = smov %s3307_s20  ;;  %15 = sbr.rel (!%p13_p10) target bundleno = 4 (0x4), region = 72 }
 0x22d   :  { %1819 = vsyncpa [#allocation3], 1 }
 0x22e   :  { %1821 = vsyncpa [#allocation3 + $0x1], 1 }

</bundles_post_ra>
